<compile_context>
chip_gen: v6e
topology: v6e:2x2x1
jax: 0.10.0
libtpu: 0.0.40
codegen_flags: <defaults>
</compile_context>

<pallas_src>
import functools
import math

import jax
import jax.numpy as jnp
from jax import lax
from jax.experimental import pallas as pl
from jax.experimental.pallas import tpu as pltpu

LANE = 128
SUBLANE = 8
CHUNK = SUBLANE * LANE          # 1024 elements == one native (8,128) f32 tile
_ACC_MAX = 8                    # independent accumulator vreg-rows per core


def _tpu_info():
    """Best-effort (vmem_capacity_bytes, num_tensorcores); conservative fallbacks."""
    vmem = 64 * 1024 * 1024     # v7x has the smallest per-TC VMEM -> safe default
    cores = 1
    try:
        info = pltpu.get_tpu_info()
        vmem = int(getattr(info, "vmem_capacity_bytes", vmem))
        for name in ("num_cores", "core_count", "num_tensorcores", "tensorcore_count"):
            val = getattr(info, name, None)
            if val:
                cores = int(val)
                break
    except Exception:
        pass
    if cores == 1:
        try:
            kind = jax.devices()[0].device_kind.lower()
            if "v7" in kind or "7x" in kind:   # 2 TCs per chip on v7x
                cores = 2
        except Exception:
            pass
    return vmem, cores


def _rmse_partial_kernel(y_ref, yhat_ref, out_ref, *,
                         tile_rows, total_rows, acc_rows):
    c = pl.program_id(0)   # core-split axis (size 1 on 1-TC chips)
    i = pl.program_id(1)   # sequential reduction axis

    @pl.when(i == 0)
    def _():
        out_ref[...] = jnp.zeros_like(out_ref)

    # First logical row covered by this (c, i) step. The input index_map clamps
    # the *block* index, so a (rare) fully-out-of-range dummy step re-reads a
    # valid block which the mask below zeroes out.
    row0 = (c * pl.num_programs(1) + i) * tile_rows

    # Native-dtype load; upcast in VMEM.
    d = yhat_ref[...].astype(jnp.float32) - y_ref[...].astype(jnp.float32)

    def accumulate(dv):
        # acc_rows (up to 64 rows = 8 f32 vregs) independent accumulator
        # chains: pure VPU adds, no per-step cross-lane reduce.
        out_ref[...] += jnp.sum(
            (dv * dv).reshape(tile_rows // acc_rows, acc_rows, LANE), axis=0)

    # Only steps that straddle (or lie past) the end of the array pay for the
    # iota/compare/where masking work.
    needs_mask = row0 + tile_rows > total_rows

    @pl.when(needs_mask)
    def _():
        rid = row0 + lax.broadcasted_iota(jnp.int32, (tile_rows, 1), 0)
        accumulate(jnp.where(rid < total_rows, d, 0.0))

    @pl.when(jnp.logical_not(needs_mask))
    def _():
        accumulate(d)


def rmse_loss(y, yhat, *, block_budget_bytes=None):
    """Pallas implementation of RMSELoss.forward(y, yhat)."""
    assert y.shape == yhat.shape, "y and yhat must have identical shapes"
    batch = y.shape[0]
    n = math.prod(y.shape)

    # Flatten (free for contiguous inputs), keep native dtype.
    yf = y.reshape(-1)
    yhf = yhat.reshape(-1)

    # Fast path: whole number of (8,128) tiles -> zero wrapper data movement.
    # Rare path: one zero-pad copy (zeros contribute 0 to the sum).
    if n % CHUNK != 0:
        pad = (-n) % CHUNK
        yf = jnp.pad(yf, (0, pad))
        yhf = jnp.pad(yhf, (0, pad))
        n += pad

    rows = n // LANE                      # multiple of 8
    y2 = yf.reshape(rows, LANE)
    yh2 = yhf.reshape(rows, LANE)

    itemsize = jnp.dtype(y.dtype).itemsize
    sub = SUBLANE * max(1, 4 // itemsize)          # packed-sublane granularity

    vmem_cap, cores = _tpu_info()
    # Byte budget per input block: double-buffered 2 inputs => ~4x blocks
    # resident; keep that well under VMEM (<= ~half on the 64 MiB v7x parts).
    if block_budget_bytes is None:
        block_budget_bytes = min(8 * 1024 * 1024, vmem_cap // 8)
    block_budget_bytes = max(block_budget_bytes, CHUNK * itemsize)

    # Row-tile granularity: native packing AND the 8-way accumulator split.
    gran = max(sub, _ACC_MAX * SUBLANE)
    budget_rows = max(gran, (block_budget_bytes // (LANE * itemsize)) // gran * gran)
    if rows >= gran:
        tr = max(gran, min(budget_rows, (rows // gran) * gran))
    else:
        tr = rows                                   # tiny array: single block
    acc_groups = next(a for a in (8, 4, 2, 1) if tr % (a * SUBLANE) == 0)
    acc_rows = acc_groups * SUBLANE

    nblocks = pl.cdiv(rows, tr)

    # 2-TC split only when it is a real split on this part AND it does not
    # force a wasted fully-masked dummy-block read for small inputs.
    ncores = 1
    if cores >= 2 and nblocks >= 2 and (nblocks % cores == 0 or nblocks >= 8 * cores):
        ncores = cores
    inner = pl.cdiv(nblocks, ncores)

    def in_map(c, i):
        # Clamp so (rare) fully-masked trailing steps never index past the array.
        return (jnp.minimum(c * inner + i, nblocks - 1), 0)

    kernel = functools.partial(_rmse_partial_kernel,
                               tile_rows=tr, total_rows=rows, acc_rows=acc_rows)

    block_bytes = tr * LANE * itemsize
    # Explicit scoped-VMEM limit: 2 inputs x 2 buffers + output + headroom,
    # never above the part's physical capacity (64 MiB on v7x).
    vmem_limit = int(min(vmem_cap,
                         max(32 * 1024 * 1024, 4 * block_bytes + 16 * 1024 * 1024)))

    lead_sem = pltpu.CORE_PARALLEL if ncores >= 2 else pltpu.PARALLEL

    partials = pl.pallas_call(
        kernel,
        out_shape=jax.ShapeDtypeStruct((ncores * acc_rows, LANE), jnp.float32),
        grid_spec=pltpu.PrefetchScalarGridSpec(
            num_scalar_prefetch=0,
            grid=(ncores, inner),
            in_specs=[
                pl.BlockSpec((tr, LANE), in_map),
                pl.BlockSpec((tr, LANE), in_map),
            ],
            out_specs=pl.BlockSpec((acc_rows, LANE), lambda c, i: (c, 0)),
        ),
        compiler_params=pltpu.CompilerParams(
            dimension_semantics=(lead_sem, pltpu.ARBITRARY),
            vmem_limit_bytes=vmem_limit,
        ),
    )(y2, yh2)

    # Tiny scalar epilogue: cross-lane sum of the resident partials, divide by
    # batch (PyTorch semantics: norm^2 / y.shape[0]), sqrt.
    return jnp.sqrt(jnp.sum(partials) / batch)


def _rmse_ref(y, yhat):
    d = yhat.astype(jnp.float32) - y.astype(jnp.float32)
    return jnp.sqrt(jnp.sum(d * d) / y.shape[0])


if __name__ == "__main__":
    key = jax.random.PRNGKey(0)
    cases = []

    # Small NCHW tensors, typical loss usage (fast path, single block).
    k1, k2 = jax.random.split(key)
    cases.append((jax.random.normal(k1, (2, 4, 16, 16), dtype=jnp.float32),
                  jax.random.normal(k2, (2, 4, 16, 16), dtype=jnp.float32),
                  None))

    # Forced small block budget: multi-block grid + ragged, masked last block.
    k3, k4 = jax.random.split(k2)
    cases.append((jax.random.normal(k3, (4, 5, 128, 128), dtype=jnp.float32),
                  jax.random.normal(k4, (4, 5, 128, 128), dtype=jnp.float32),
                  1 << 20))

    # Rare padded path + low-precision dtype (bf16 read natively).
    k5, k6 = jax.random.split(k4)
    cases.append((
        jax.random.normal(k5, (3, 5, 7, 11), dtype=jnp.float32).astype(jnp.bfloat16),
        jax.random.normal(k6, (3, 5, 7, 11), dtype=jnp.float32).astype(jnp.bfloat16),
        None))

    for yy, yh, budget in cases:
        loss = jax.block_until_ready(rmse_loss(yy, yh, block_budget_bytes=budget))
        ref = _rmse_ref(yy, yh)
        assert jnp.allclose(loss, ref, rtol=1e-4, atol=1e-5), (yy.shape, loss, ref)
    print("KERNEL_OK")
</pallas_src>

<mosaic_0001>
module attributes {stable_mosaic.version = 11 : i64} {
  func.func @_rmse_partial_kernel(%arg0: i32, %arg1: i32, %arg2: memref<16x128xf32, #tpu.memory_space<vmem>>, %arg3: memref<16x128xf32, #tpu.memory_space<vmem>>, %arg4: memref<16x128xf32, #tpu.memory_space<vmem>>) attributes {dimension_semantics = [#tpu.dimension_semantics<parallel>, #tpu.dimension_semantics<arbitrary>], iteration_bounds = array<i64: 1, 1>, scalar_prefetch = 0 : i64, scratch_operands = 0 : i64, tpu.core_type = #tpu.core_type<tc>, window_params = [{transform_indices = @transform_0, window_bounds = array<i64: 16, 128>}, {transform_indices = @transform_1, window_bounds = array<i64: 16, 128>}, {transform_indices = @transform_2, window_bounds = array<i64: 16, 128>}]} {
    %c0_i32 = arith.constant 0 : i32
    %0 = arith.cmpi eq, %arg1, %c0_i32 : i32
    %1 = arith.extui %0 : i1 to i32
    %c0_i32_0 = arith.constant 0 : i32
    %2 = arith.cmpi ne, %1, %c0_i32_0 : i32
    scf.if %2 {
      %cst = arith.constant 0.000000e+00 : f32
      %16 = vector.broadcast %cst : f32 to vector<16x128xf32>
      %c0_8 = arith.constant 0 : index
      %c0_9 = arith.constant 0 : index
      %17 = vector.load %arg4[%c0_8, %c0_9] : memref<16x128xf32, #tpu.memory_space<vmem>>, vector<16x128xf32>
      tpu.vector_store %arg4[%c0_8, %c0_9], %16 {strides = array<i32>} : memref<16x128xf32, #tpu.memory_space<vmem>>, vector<16x128xf32>,
    } else {
    }
    %c1_i32 = arith.constant 1 : i32
    %3 = arith.muli %arg0, %c1_i32 : i32
    %4 = arith.addi %3, %arg1 : i32
    %c16_i32 = arith.constant 16 : i32
    %5 = arith.muli %4, %c16_i32 : i32
    %c0 = arith.constant 0 : index
    %c0_1 = arith.constant 0 : index
    %6 = vector.load %arg3[%c0, %c0_1] : memref<16x128xf32, #tpu.memory_space<vmem>>, vector<16x128xf32>
    %c0_2 = arith.constant 0 : index
    %c0_3 = arith.constant 0 : index
    %7 = vector.load %arg2[%c0_2, %c0_3] : memref<16x128xf32, #tpu.memory_space<vmem>>, vector<16x128xf32>
    %8 = arith.subf %6, %7 : vector<16x128xf32>
    %c16_i32_4 = arith.constant 16 : i32
    %9 = arith.addi %5, %c16_i32_4 : i32
    %c16_i32_5 = arith.constant 16 : i32
    %10 = arith.cmpi sgt, %9, %c16_i32_5 : i32
    %11 = arith.extui %10 : i1 to i32
    %c0_i32_6 = arith.constant 0 : i32
    %12 = arith.cmpi ne, %11, %c0_i32_6 : i32
    scf.if %12 {
      %16 = tpu.iota {dimensions = array<i32: 0>} : vector<16x1xi32>
      %17 = vector.broadcast %5 : i32 to vector<16x1xi32>
      %18 = arith.addi %17, %16 : vector<16x1xi32>
      %c16_i32_8 = arith.constant 16 : i32
      %19 = vector.broadcast %c16_i32_8 : i32 to vector<16x1xi32>
      %20 = arith.cmpi slt, %18, %19 : vector<16x1xi32>
      %cst = arith.constant 0.000000e+00 : f32
      %21 = vector.shape_cast %20 : vector<16x1xi1> to vector<16x1xi1>
      %22 = vector.broadcast %21 : vector<16x1xi1> to vector<16x128xi1>
      %23 = vector.broadcast %cst : f32 to vector<16x128xf32>
      %24 = arith.select %22, %8, %23 : vector<16x128xi1>, vector<16x128xf32>
      %c0_9 = arith.constant 0 : index
      %c0_10 = arith.constant 0 : index
      %25 = vector.load %arg4[%c0_9, %c0_10] : memref<16x128xf32, #tpu.memory_space<vmem>>, vector<16x128xf32>
      %26 = arith.mulf %24, %24 : vector<16x128xf32>
      %27 = vector.shape_cast %26 : vector<16x128xf32> to vector<1x16x128xf32>
      %cst_11 = arith.constant dense<0.000000e+00> : vector<16x128xf32>
      %28 = vector.multi_reduction <add>, %27, %cst_11 [0] : vector<1x16x128xf32> to vector<16x128xf32>
      %29 = arith.addf %25, %28 : vector<16x128xf32>
      %c0_12 = arith.constant 0 : index
      %c0_13 = arith.constant 0 : index
      %30 = vector.load %arg4[%c0_12, %c0_13] : memref<16x128xf32, #tpu.memory_space<vmem>>, vector<16x128xf32>
      tpu.vector_store %arg4[%c0_12, %c0_13], %29 {strides = array<i32>} : memref<16x128xf32, #tpu.memory_space<vmem>>, vector<16x128xf32>,
    } else {
    }
    %true = arith.constant true
    %13 = arith.xori %10, %true : i1
    %14 = arith.extui %13 : i1 to i32
    %c0_i32_7 = arith.constant 0 : i32
    %15 = arith.cmpi ne, %14, %c0_i32_7 : i32
    scf.if %15 {
      %c0_8 = arith.constant 0 : index
      %c0_9 = arith.constant 0 : index
      %16 = vector.load %arg4[%c0_8, %c0_9] : memref<16x128xf32, #tpu.memory_space<vmem>>, vector<16x128xf32>
      %17 = arith.mulf %8, %8 : vector<16x128xf32>
      %18 = vector.shape_cast %17 : vector<16x128xf32> to vector<1x16x128xf32>
      %cst = arith.constant dense<0.000000e+00> : vector<16x128xf32>
      %19 = vector.multi_reduction <add>, %18, %cst [0] : vector<1x16x128xf32> to vector<16x128xf32>
      %20 = arith.addf %16, %19 : vector<16x128xf32>
      %c0_10 = arith.constant 0 : index
      %c0_11 = arith.constant 0 : index
      %21 = vector.load %arg4[%c0_10, %c0_11] : memref<16x128xf32, #tpu.memory_space<vmem>>, vector<16x128xf32>
      tpu.vector_store %arg4[%c0_10, %c0_11], %20 {strides = array<i32>} : memref<16x128xf32, #tpu.memory_space<vmem>>, vector<16x128xf32>,
    } else {
    }
    return
  }
  func.func @transform_0(%arg0: i32, %arg1: i32) -> (i32, i32) {
    %c1_i32 = arith.constant 1 : i32
    %0 = arith.muli %arg0, %c1_i32 : i32
    %1 = arith.addi %0, %arg1 : i32
    %c0_i32 = arith.constant 0 : i32
    %2 = arith.minsi %1, %c0_i32 : i32
    %c0_i32_0 = arith.constant 0 : i32
    %c0_i32_1 = arith.constant 0 : i32
    return %2, %c0_i32_0 : i32, i32
  }
  func.func @transform_1(%arg0: i32, %arg1: i32) -> (i32, i32) {
    %c1_i32 = arith.constant 1 : i32
    %0 = arith.muli %arg0, %c1_i32 : i32
    %1 = arith.addi %0, %arg1 : i32
    %c0_i32 = arith.constant 0 : i32
    %2 = arith.minsi %1, %c0_i32 : i32
    %c0_i32_0 = arith.constant 0 : i32
    %c0_i32_1 = arith.constant 0 : i32
    return %2, %c0_i32_0 : i32, i32
  }
  func.func @transform_2(%arg0: i32, %arg1: i32) -> (i32, i32) {
    %c0_i32 = arith.constant 0 : i32
    %c0_i32_0 = arith.constant 0 : i32
    return %arg0, %c0_i32 : i32, i32
  }
}

</mosaic_0001>

<bundles_post_ra>
// kernel: tpu_custom_call.1
= control target key start
LH: loop header
LB: loop body
LE: loop exit
PB: predicated region body
PF: predicated region fallthrough
CT: control target
= control target key end

     0   :  { %7 = vsyncpa [#allocation3], 0  ;;  %s249_s0 = inlined_call_operand.hbm [shape: f32[16,128], index: 0, kind: input, shape index: {}]   ;;  %s250_s1 = inlined_call_operand.hbm [shape: f32[16,128], index: 1, kind: input, shape index: {}]   ;;  %s251_s2 = inlined_call_operand.hbm [shape: f32[16,128], index: 2, kind: output, shape index: {}]  }
   0x1   :  { %8 = vsyncpa [#allocation6], 0 }
   0x2   :  { %9 = vsyncpa [#allocation4], 0  ;;  %s211_s9 = smov [#allocation2]  }
   0x3   :  { %s21_s10 = sshll.u32 %s211_s9, 4  ;;  %s22_s10 = int_to_ptr.vmem [resolvable:$true] %s21_s10 }
   0x4   :  { %s153_s11 = scalar_lea.vmem %s22_s10, 256  ;;  %p158_p1 = scmp.lt.s32.totalorder %s22_s10, %s22_s10 }
   0x5   :  { %p154_p0 = scmp.ne.s32.totalorder %s22_s10, %s153_s11  ;;  %p159_p2 = scmp.lt.s32.totalorder %s153_s11, %s153_s11 }
   0x7   :  { %p160_p3 = por %p159_p2, %p158_p1 }
   0x9   :  { %p161_p4 = pnand %p160_p3, %p154_p0 }
   0xb   :  { %164 = shalt.err (!%p161_p4)
}
   0xc   :  { %s212_s12 = smov 128   ;;  %s213_s13 = smov 8  }
   0xd   :  { %27 = dma.hbm_to_vmem [thread:$0]  %s249_s0, 256, %s22_s10, [#allocation3], %s212_s12, %s212_s12, %s213_s13  }
   0xe   :  { %s214_s16 = smov [#allocation5]  }
   0xf   :  { %s39_s17 = sshll.u32 %s214_s16, 4  ;;  %s40_s17 = int_to_ptr.vmem [resolvable:$true] %s39_s17 }
  0x10   :  { %s173_s18 = scalar_lea.vmem %s40_s17, 256  ;;  %p178_p6 = scmp.lt.s32.totalorder %s40_s17, %s40_s17 }
  0x11   :  { %p174_p5 = scmp.ne.s32.totalorder %s40_s17, %s173_s18  ;;  %p179_p7 = scmp.lt.s32.totalorder %s173_s18, %s173_s18 }
  0x13   :  { %p180_p8 = por %p179_p7, %p178_p6 }
  0x15   :  { %p181_p9 = pnand %p180_p8, %p174_p5 }
  0x17   :  { %184 = shalt.err (!%p181_p9)
}
  0x18   :  { %45 = dma.hbm_to_vmem [thread:$0]  %s250_s1, 256, %s40_s17, [#allocation6], %s212_s12, %s212_s12, %s213_s13  }
  0x19   :  { %205 = dma.done.wait [#allocation3], 256  }
  0x1a   :  { %206 = vsyncadd [#allocation3], 4294967040 }
  0x1b   :  { %207 = dma.done.wait [#allocation6], 256  }
  0x1c   :  { %208 = vsyncadd [#allocation6], 4294967040  ;;  %v68_v0 = vld [vmem:[#allocation5] sm:$0xff]  ;;  %v70_v1 = vld [vmem:[#allocation2] sm:$0xff]  ;;  %s215_s0 = smov [#allocation7]  }
  0x1d   :  { %v69_v2 = vld [vmem:[#allocation5 + $0x8] sm:$0xff]  ;;  %v72_v3 = vsub.f32 %v68_v0, %v70_v1  ;;  %v71_v4 = vld [vmem:[#allocation2 + $0x8] sm:$0xff]  ;;  %s122_s21 = sshll.u32 %s215_s0, 4  ;;  %s123_s21 = int_to_ptr.vmem [resolvable:$true] %s122_s21 }
  0x1e   :  { %v73_v5 = vsub.f32 %v69_v2, %v71_v4  ;;  %s185_s22 = scalar_lea.vmem %s123_s21, 256  ;;  %p190_p11 = scmp.lt.s32.totalorder %s123_s21, %s123_s21 }
  0x1f   :  { %v109_v6 = vmul.f32 %v72_v3, %v72_v3  ;;  %p186_p10 = scmp.ne.s32.totalorder %s123_s21, %s185_s22  ;;  %p191_p12 = scmp.lt.s32.totalorder %s185_s22, %s185_s22 }
  0x20   :  { %v110_v7 = vmul.f32 %v73_v5, %v73_v5 }
  0x21   :  { %115 = vst [vmem:[#allocation7] sm:$0xff] %v109_v6  ;;  %p192_p13 = por %p191_p12, %p190_p11 }
  0x22   :  { %116 = vst [vmem:[#allocation7 + $0x8] sm:$0xff] %v110_v7 }
  0x23   :  { %p193_p0 = pnand %p192_p13, %p186_p10 }
  0x25   :  { %196 = shalt.err (!%p193_p0)
}
  0x26   :  { %128 = dma.vmem_to_hbm [thread:$0]  %s123_s21, 256, %s251_s2, [#allocation4], %s212_s12, %s212_s12, %s213_s13  }
  0x27   :  { %209 = dma.done.wait [#allocation4], 256  }
  0x28   :  { %210 = vsyncadd [#allocation4], 4294967040 }
  0x29   :  { %132 = vsyncpa [#allocation3], 1 }
  0x2a   :  { %133 = vsyncpa [#allocation6], 1 }
  0x2b   :  { %134 = vsyncpa [#allocation4], 1 }

</bundles_post_ra>
